<compile_context>
chip_gen: v7x
topology: tpu7x:2x2x1
jax: 0.10.0
libtpu: 0.0.40
codegen_flags: <defaults>
</compile_context>

<pallas_src>
import functools

import jax
import jax.numpy as jnp
from jax import lax
from jax.experimental import pallas as pl
from jax.experimental.pallas import tpu as pltpu


def fixed_hidden_mlp_kernel(x_ref, w12_ref, b12_ref, w_ref, b_ref,
                            o_ref, acc_ref,
                            *, batch, bt, n_inner, needs_mask):
    inner = pl.program_id(1)

    @pl.when(inner == 0)
    def _init():
        acc_ref[0] = jnp.float32(0.0)   # running sum(|Y|) for this core slice
        acc_ref[1] = jnp.float32(0.0)   # running sum(Y)

    # Fused first two layers: h^T = relu(W12^T @ X^T + b12^T)
    # (W12 = W @ rand_weight, b12 = b @ rand_weight + 1, precomputed in wrapper)
    h = jnp.maximum(
        jnp.dot(w12_ref[...], x_ref[...],
                preferred_element_type=jnp.float32) + b12_ref[...],
        0.0)
    # Second application of the same Linear: y^T = W^T @ h^T + b^T
    y = jnp.dot(w_ref[...], h.astype(w_ref.dtype),
                preferred_element_type=jnp.float32) + b_ref[...]

    if needs_mask:
        # Zero-padded columns exist only in the tail tile(s); mask only there so
        # the hot path stays mask-free.
        start = (pl.program_id(0) * n_inner + inner) * bt
        tile_has_pad = start + bt > batch

        @pl.when(tile_has_pad)
        def _tail():
            col = start + lax.broadcasted_iota(jnp.int32, y.shape, 1)
            ym = jnp.where(col < batch, y, 0.0)
            acc_ref[0] += jnp.sum(jnp.abs(ym))
            acc_ref[1] += jnp.sum(ym)

        @pl.when(jnp.logical_not(tile_has_pad))
        def _full():
            acc_ref[0] += jnp.sum(jnp.abs(y))
            acc_ref[1] += jnp.sum(y)
    else:
        acc_ref[0] += jnp.sum(jnp.abs(y))
        acc_ref[1] += jnp.sum(y)

    @pl.when(inner == pl.num_programs(1) - 1)
    def _finalize():
        # Per-core partials: row 0 holds sum(|Y|), row 1 holds sum(Y).
        row = lax.broadcasted_iota(jnp.int32, (8, 128), 0)
        vals = jnp.where(row == 0, acc_ref[0],
                         jnp.where(row == 1, acc_ref[1], 0.0))
        o_ref[...] = vals.reshape(1, 8, 128)


def fixed_hidden_mlp_forward(x, w, b, rw, *, block_lanes=2048):
    """FixedHiddenMLP forward: returns a scalar (X.sum() after halving loop).

    x : (batch, 20) f32    w : (20, 20) f32  (Linear weight, stored (in, out))
    b : (1, 20)    f32     rw: (20, 20) f32  (fixed rand_weight)
    """
    batch, d_in = x.shape
    f32, bf16 = jnp.float32, jnp.bfloat16
    block_lanes = max(128, (block_lanes // 128) * 128)

    # --- Algebraic fusion of the first two matmuls (f32 precompute) ---
    w12 = jnp.dot(w, rw)            # (20, 20) f32
    b12 = jnp.dot(b, rw) + 1.0      # (1, 20)  f32

    # --- Lane-dense transposed layout: features -> sublanes, batch -> lanes ---
    x_t = x.T.astype(bf16)          # (20, batch)  bf16
    w12_t = w12.T.astype(bf16)      # (20, 20)     bf16
    w_t = w.T.astype(bf16)          # (20, 20)     bf16
    b12_c = b12.T.astype(f32)       # (20, 1)      f32
    b_c = b.T.astype(f32)           # (20, 1)      f32

    if batch <= block_lanes:
        # Single-shot path (demo batch=2): block == full array, no padding.
        bt, n_outer, n_inner, padded = batch, 1, 1, batch
    else:
        bt = block_lanes
        tiles = pl.cdiv(batch, bt)
        n_outer = 2                      # per-TensorCore partials on v7x
        n_inner = pl.cdiv(tiles, n_outer)
        padded = n_outer * n_inner * bt
    needs_mask = padded != batch
    if needs_mask:
        x_t = jnp.pad(x_t, ((0, 0), (0, padded - batch)))

    kernel = functools.partial(fixed_hidden_mlp_kernel, batch=batch, bt=bt,
                               n_inner=n_inner, needs_mask=needs_mask)

    partials = pl.pallas_call(
        kernel,
        out_shape=jax.ShapeDtypeStruct((n_outer, 8, 128), f32),
        grid_spec=pltpu.PrefetchScalarGridSpec(
            num_scalar_prefetch=0,
            grid=(n_outer, n_inner),
            in_specs=[
                # x tiled over the lane (batch) axis
                pl.BlockSpec((d_in, bt), lambda c, i: (0, c * n_inner + i)),
                # weights / biases: constant index maps -> VMEM-resident
                pl.BlockSpec(w12_t.shape, lambda c, i: (0, 0)),
                pl.BlockSpec(b12_c.shape, lambda c, i: (0, 0)),
                pl.BlockSpec(w_t.shape, lambda c, i: (0, 0)),
                pl.BlockSpec(b_c.shape, lambda c, i: (0, 0)),
            ],
            # One lane-dense partials block per outer ("core") index.
            out_specs=pl.BlockSpec((1, 8, 128), lambda c, i: (c, 0, 0)),
            scratch_shapes=[pltpu.SMEM((2,), f32)],   # [sum|Y|, sum Y]
        ),
        compiler_params=pltpu.CompilerParams(
            # Outer axis splits across TensorCores on v7x; inner batch axis is
            # a reduction into the scalar accumulator -> "arbitrary".
            dimension_semantics=("parallel", "arbitrary")),
    )(x_t, w12_t, b12_c, w_t, b_c)

    abs_sum = jnp.sum(partials[:, 0, 0])
    total = jnp.sum(partials[:, 1, 0])

    # while X.abs().sum() > 1: X /= 2 ; return X.sum()
    # Halving every element halves both sums exactly, so iterate on the two
    # scalars only.  The isfinite guard terminates instead of hanging if the
    # accumulated abs-sum ever overflows to inf.
    def cond(c):
        a, _ = c
        return (a > 1.0) & jnp.isfinite(a)

    def body(c):
        a, s = c
        return a * 0.5, s * 0.5

    _, result = lax.while_loop(cond, body, (abs_sum, total))
    return result


def fixed_hidden_mlp_reference(x, w, b, rw):
    """Pure-JAX reference with the same fusion / dtype policy as the kernel."""
    f32, bf16 = jnp.float32, jnp.bfloat16
    w12 = jnp.dot(w, rw)
    b12 = jnp.dot(b, rw) + 1.0
    h = jnp.maximum(
        jnp.dot(x.astype(bf16), w12.astype(bf16),
                preferred_element_type=f32) + b12, 0.0)
    y = jnp.dot(h.astype(bf16), w.astype(bf16),
                preferred_element_type=f32) + b
    y = lax.while_loop(lambda c: jnp.sum(jnp.abs(c)) > 1.0,
                       lambda c: c * 0.5, y)
    return jnp.sum(y)


if __name__ == "__main__":
    key = jax.random.PRNGKey(0)
    kx, kw, kb, kr = jax.random.split(key, 4)

    in_features = out_features = 20
    batch = 2

    # X = torch.rand(2, 20)
    x = jax.random.uniform(kx, (batch, in_features), jnp.float32)

    # nn.Linear(20, 20) default init: U(-1/sqrt(fan_in), 1/sqrt(fan_in)).
    # Weight stored transposed as (in, out) so linear(X) = X @ w + b.
    bound = 1.0 / jnp.sqrt(jnp.float32(in_features))
    w = jax.random.uniform(kw, (in_features, out_features), jnp.float32,
                           minval=-bound, maxval=bound)
    b = jax.random.uniform(kb, (1, out_features), jnp.float32,
                           minval=-bound, maxval=bound)
    # self.rand_weight = torch.rand((20, 20))  — fixed, non-trainable constant.
    rw = jax.random.uniform(kr, (in_features, out_features), jnp.float32)

    out = fixed_hidden_mlp_forward(x, w, b, rw)
    jax.block_until_ready(out)

    ref = fixed_hidden_mlp_reference(x, w, b, rw)
    assert out.shape == (), out.shape
    assert jnp.allclose(out, ref, rtol=1e-3, atol=1e-3), (out, ref)

    print("KERNEL_OK")
</pallas_src>

<mosaic_0001>
module attributes {stable_mosaic.version = 11 : i64} {
  func.func @fixed_hidden_mlp_kernel(%arg0: i32, %arg1: i32, %arg2: memref<20x2xbf16, #tpu.memory_space<vmem>>, %arg3: memref<20x20xbf16, #tpu.memory_space<vmem>>, %arg4: memref<20x1xf32, #tpu.memory_space<vmem>>, %arg5: memref<20x20xbf16, #tpu.memory_space<vmem>>, %arg6: memref<20x1xf32, #tpu.memory_space<vmem>>, %arg7: memref<1x8x128xf32, #tpu.memory_space<vmem>>, %arg8: memref<2xf32, #tpu.memory_space<smem>>) attributes {dimension_semantics = [#tpu.dimension_semantics<parallel>, #tpu.dimension_semantics<arbitrary>], iteration_bounds = array<i64: 1, 1>, scalar_prefetch = 0 : i64, scratch_operands = 1 : i64, tpu.core_type = #tpu.core_type<tc>, window_params = [{transform_indices = @transform_0, window_bounds = array<i64: 20, 2>}, {pipeline_mode = #tpu.pipeline_mode<synchronous>, transform_indices = @transform_1, window_bounds = array<i64: 20, 20>}, {pipeline_mode = #tpu.pipeline_mode<synchronous>, transform_indices = @transform_2, window_bounds = array<i64: 20, 1>}, {pipeline_mode = #tpu.pipeline_mode<synchronous>, transform_indices = @transform_3, window_bounds = array<i64: 20, 20>}, {pipeline_mode = #tpu.pipeline_mode<synchronous>, transform_indices = @transform_4, window_bounds = array<i64: 20, 1>}, {transform_indices = @transform_5, window_bounds = array<i64: 1, 8, 128>}]} {
    %c0_i32 = arith.constant 0 : i32
    %0 = arith.cmpi eq, %arg1, %c0_i32 : i32
    %1 = arith.extui %0 : i1 to i32
    %c0_i32_0 = arith.constant 0 : i32
    %2 = arith.cmpi ne, %1, %c0_i32_0 : i32
    scf.if %2 {
      %cst_19 = arith.constant 0.000000e+00 : f32
      %c0_20 = arith.constant 0 : index
      %35 = memref.load %arg8[%c0_20] : memref<2xf32, #tpu.memory_space<smem>>
      memref.store %cst_19, %arg8[%c0_20] : memref<2xf32, #tpu.memory_space<smem>>
      %cst_21 = arith.constant 0.000000e+00 : f32
      %c1_22 = arith.constant 1 : index
      %36 = memref.load %arg8[%c1_22] : memref<2xf32, #tpu.memory_space<smem>>
      memref.store %cst_21, %arg8[%c1_22] : memref<2xf32, #tpu.memory_space<smem>>
    } else {
    }
    %c0 = arith.constant 0 : index
    %c0_1 = arith.constant 0 : index
    %3 = vector.load %arg3[%c0, %c0_1] : memref<20x20xbf16, #tpu.memory_space<vmem>>, vector<20x20xbf16>
    %c0_2 = arith.constant 0 : index
    %c0_3 = arith.constant 0 : index
    %4 = vector.load %arg2[%c0_2, %c0_3] : memref<20x2xbf16, #tpu.memory_space<vmem>>, vector<20x2xbf16>
    %cst = arith.constant dense<0.000000e+00> : vector<20x2xf32>
    %5 = tpu.matmul %3, %4, %cst {dimension_numbers = #tpu.dot_dimension_numbers<[1], [0], [0], [1], [0, 0, 1, 1], [], []>} : vector<20x20xbf16>, vector<20x2xbf16>, vector<20x2xf32> -> vector<20x2xf32>
    %c0_4 = arith.constant 0 : index
    %c0_5 = arith.constant 0 : index
    %6 = vector.load %arg4[%c0_4, %c0_5] : memref<20x1xf32, #tpu.memory_space<vmem>>, vector<20x1xf32>
    %7 = vector.broadcast %6 : vector<20x1xf32> to vector<20x2xf32>
    %8 = arith.addf %5, %7 : vector<20x2xf32>
    %cst_6 = arith.constant 0.000000e+00 : f32
    %9 = vector.broadcast %cst_6 : f32 to vector<20x2xf32>
    %10 = arith.maximumf %8, %9 : vector<20x2xf32>
    %c0_7 = arith.constant 0 : index
    %c0_8 = arith.constant 0 : index
    %11 = vector.load %arg5[%c0_7, %c0_8] : memref<20x20xbf16, #tpu.memory_space<vmem>>, vector<20x20xbf16>
    %12 = arith.truncf %10 : vector<20x2xf32> to vector<20x2xbf16>
    %cst_9 = arith.constant dense<0.000000e+00> : vector<20x2xf32>
    %13 = tpu.matmul %11, %12, %cst_9 {dimension_numbers = #tpu.dot_dimension_numbers<[1], [0], [0], [1], [0, 0, 1, 1], [], []>} : vector<20x20xbf16>, vector<20x2xbf16>, vector<20x2xf32> -> vector<20x2xf32>
    %c0_10 = arith.constant 0 : index
    %c0_11 = arith.constant 0 : index
    %14 = vector.load %arg6[%c0_10, %c0_11] : memref<20x1xf32, #tpu.memory_space<vmem>>, vector<20x1xf32>
    %15 = vector.broadcast %14 : vector<20x1xf32> to vector<20x2xf32>
    %16 = arith.addf %13, %15 : vector<20x2xf32>
    %c0_12 = arith.constant 0 : index
    %17 = memref.load %arg8[%c0_12] : memref<2xf32, #tpu.memory_space<smem>>
    %18 = math.absf %16 : vector<20x2xf32>
    %19 = vector.shape_cast %18 : vector<20x2xf32> to vector<1x20x2xf32>
    %cst_13 = arith.constant dense<0.000000e+00> : vector<1xf32>
    %20 = vector.multi_reduction <add>, %19, %cst_13 [1, 2] : vector<1x20x2xf32> to vector<1xf32>
    %21 = vector.shape_cast %20 : vector<1xf32> to vector<1x1x1xf32>
    %22 = vector.extract %21[0, 0, 0] : f32 from vector<1x1x1xf32>
    %23 = arith.addf %17, %22 : f32
    %c0_14 = arith.constant 0 : index
    %24 = memref.load %arg8[%c0_14] : memref<2xf32, #tpu.memory_space<smem>>
    memref.store %23, %arg8[%c0_14] : memref<2xf32, #tpu.memory_space<smem>>
    %c1 = arith.constant 1 : index
    %25 = memref.load %arg8[%c1] : memref<2xf32, #tpu.memory_space<smem>>
    %26 = vector.shape_cast %16 : vector<20x2xf32> to vector<1x20x2xf32>
    %cst_15 = arith.constant dense<0.000000e+00> : vector<1xf32>
    %27 = vector.multi_reduction <add>, %26, %cst_15 [1, 2] : vector<1x20x2xf32> to vector<1xf32>
    %28 = vector.shape_cast %27 : vector<1xf32> to vector<1x1x1xf32>
    %29 = vector.extract %28[0, 0, 0] : f32 from vector<1x1x1xf32>
    %30 = arith.addf %25, %29 : f32
    %c1_16 = arith.constant 1 : index
    %31 = memref.load %arg8[%c1_16] : memref<2xf32, #tpu.memory_space<smem>>
    memref.store %30, %arg8[%c1_16] : memref<2xf32, #tpu.memory_space<smem>>
    %c0_i32_17 = arith.constant 0 : i32
    %32 = arith.cmpi eq, %arg1, %c0_i32_17 : i32
    %33 = arith.extui %32 : i1 to i32
    %c0_i32_18 = arith.constant 0 : i32
    %34 = arith.cmpi ne, %33, %c0_i32_18 : i32
    scf.if %34 {
      %35 = tpu.iota {dimensions = array<i32: 0>} : vector<8x128xi32>
      %c0_i32_19 = arith.constant 0 : i32
      %36 = vector.broadcast %c0_i32_19 : i32 to vector<8x128xi32>
      %37 = arith.cmpi eq, %35, %36 : vector<8x128xi32>
      %c0_20 = arith.constant 0 : index
      %38 = memref.load %arg8[%c0_20] : memref<2xf32, #tpu.memory_space<smem>>
      %c1_i32 = arith.constant 1 : i32
      %39 = vector.broadcast %c1_i32 : i32 to vector<8x128xi32>
      %40 = arith.cmpi eq, %35, %39 : vector<8x128xi32>
      %c1_21 = arith.constant 1 : index
      %41 = memref.load %arg8[%c1_21] : memref<2xf32, #tpu.memory_space<smem>>
      %cst_22 = arith.constant 0.000000e+00 : f32
      %42 = vector.broadcast %41 : f32 to vector<8x128xf32>
      %43 = vector.broadcast %cst_22 : f32 to vector<8x128xf32>
      %44 = arith.select %40, %42, %43 : vector<8x128xi1>, vector<8x128xf32>
      %45 = vector.broadcast %38 : f32 to vector<8x128xf32>
      %46 = arith.select %37, %45, %44 : vector<8x128xi1>, vector<8x128xf32>
      %47 = vector.shape_cast %46 : vector<8x128xf32> to vector<1x8x128xf32>
      %c0_23 = arith.constant 0 : index
      %c0_24 = arith.constant 0 : index
      %c0_25 = arith.constant 0 : index
      %48 = vector.load %arg7[%c0_23, %c0_24, %c0_25] : memref<1x8x128xf32, #tpu.memory_space<vmem>>, vector<1x8x128xf32>
      tpu.vector_store %arg7[%c0_23, %c0_24, %c0_25], %47 {strides = array<i32>} : memref<1x8x128xf32, #tpu.memory_space<vmem>>, vector<1x8x128xf32>,
    } else {
    }
    return
  }
  func.func @transform_0(%arg0: i32, %arg1: i32) -> (i32, i32) {
    %c1_i32 = arith.constant 1 : i32
    %0 = arith.muli %arg0, %c1_i32 : i32
    %1 = arith.addi %0, %arg1 : i32
    %c0_i32 = arith.constant 0 : i32
    %c0_i32_0 = arith.constant 0 : i32
    return %c0_i32, %1 : i32, i32
  }
  func.func @transform_1(%arg0: i32, %arg1: i32) -> (i32, i32) {
    %c0_i32 = arith.constant 0 : i32
    %c0_i32_0 = arith.constant 0 : i32
    %c0_i32_1 = arith.constant 0 : i32
    return %c0_i32, %c0_i32_0 : i32, i32
  }
  func.func @transform_2(%arg0: i32, %arg1: i32) -> (i32, i32) {
    %c0_i32 = arith.constant 0 : i32
    %c0_i32_0 = arith.constant 0 : i32
    %c0_i32_1 = arith.constant 0 : i32
    return %c0_i32, %c0_i32_0 : i32, i32
  }
  func.func @transform_3(%arg0: i32, %arg1: i32) -> (i32, i32) {
    %c0_i32 = arith.constant 0 : i32
    %c0_i32_0 = arith.constant 0 : i32
    %c0_i32_1 = arith.constant 0 : i32
    return %c0_i32, %c0_i32_0 : i32, i32
  }
  func.func @transform_4(%arg0: i32, %arg1: i32) -> (i32, i32) {
    %c0_i32 = arith.constant 0 : i32
    %c0_i32_0 = arith.constant 0 : i32
    %c0_i32_1 = arith.constant 0 : i32
    return %c0_i32, %c0_i32_0 : i32, i32
  }
  func.func @transform_5(%arg0: i32, %arg1: i32) -> (i32, i32, i32) {
    %c0_i32 = arith.constant 0 : i32
    %c0_i32_0 = arith.constant 0 : i32
    %c0_i32_1 = arith.constant 0 : i32
    return %arg0, %c0_i32, %c0_i32_0 : i32, i32, i32
  }
}

</mosaic_0001>

<bundles_post_ra>
// kernel: tpu_custom_call.1
= control target key start
LH: loop header
LB: loop body
LE: loop exit
PB: predicated region body
PF: predicated region fallthrough
CT: control target
= control target key end

     0   :  { %vm95_vm0 = vcmask 1041408   ;;  %vm88_vm1 = vcmask 162816   ;;  %v389_v4 = vmov 0   ;;  %s477_s0 = inlined_call_operand.vmem [shape: bf16[20,2], index: 0, kind: input, shape index: {}]   ;;  %s478_s1 = inlined_call_operand.vmem [shape: bf16[20,20], index: 1, kind: input, shape index: {}]   ;;  %s479_s2 = inlined_call_operand.vmem [shape: f32[20,1], index: 2, kind: input, shape index: {}]   ;;  %s480_s3 = inlined_call_operand.vmem [shape: bf16[20,20], index: 3, kind: input, shape index: {}]   ;;  %s481_s4 = inlined_call_operand.vmem [shape: f32[20,1], index: 4, kind: input, shape index: {}]   ;;  %s482_s5 = inlined_call_operand.hbm [shape: f32[1,8,128], index: 5, kind: output, shape index: {}]  }
   0x1   :  { %v359_v0 = vld [vmem:[%s477_s0] sm:$0xff]   ;;  %v360_v1 = vld [vmem:[%s477_s0 + $0x8] ss:$0 sps:$4 sm:$0x33]   ;;  %357 = vset.pattern.permute.xlu0 %v389_v4  ;;  %v55_v6 = vld [vmem:[%s479_s2 + $0x10] sm:$0xf]  ;;  %358 = vset.pattern.permute.xlu1 %v389_v4 }
   0x2   :  { %v361_v2 = vld [vmem:[%s478_s1] sm:$0xff]   ;;  %333 = vmatprep.subr.bf16.mxu0 %v359_v0  ;;  %v97_v3 = vsel %vm95_vm0, %v360_v1, 0  ;;  %v362_v7 = vld [vmem:[%s478_s1 + $0x8] ss:$0 sps:$4 sm:$0x33]   ;;  %68 = vperm.xlu1 %358, %v55_v6  }
   0x3   :  { %334 = vmatpush3.bf16.msra.mxu0 %v359_v0  ;;  %337 = vmatprep.mubr.msk.bf16.mxu0 %vm88_vm1, %v361_v2  ;;  %v53_v5 = vld [vmem:[%s479_s2] sm:$0xff]  ;;  %v54_v8 = vld [vmem:[%s479_s2 + $0x8] sm:$0xff] }
   0x4   :  { %349 = vmatprep.subr.msk.bf16.mxu0 %vm95_vm0, %v360_v1  ;;  %58 = vperm.xlu0 %357, %v53_v5   ;;  %v155_v9 = vld [vmem:[%s481_s4] sm:$0xff] }
   0x7   :  { %336 = vmatpush3.bf16.msra.mxu0 %v97_v3 }
   0x8   :  { %10 = vsyncpa [#allocation4], 0  ;;  %63 = vperm.xlu0 %357, %v54_v8   ;;  %v156_v10 = vld [vmem:[%s481_s4 + $0x8] sm:$0xff]  ;;  %160 = vperm.xlu1 %358, %v155_v9   ;;  %v157_v11 = vld [vmem:[%s481_s4 + $0x10] sm:$0xf]  ;;  %vm242_vm2 = vcmask 15360   ;;  %v282_v3 = vlaneseq }
   0x9   :  { %v363_v12 = vld [vmem:[%s480_s3] sm:$0xff]   ;;  %v364_v29 = vld [vmem:[%s480_s3 + $0x8] ss:$0 sps:$4 sm:$0x33]   ;;  %vm246_vm3 = vcmask 11264   ;;  %s390_s13 = smov [#allocation3]  }
   0xa   :  { %338 = vmatmul.mubr.msk.bf16.vlgmr.msra.gmra.mrb[0].mxu0 %vm88_vm1, %v362_v7  ;;  %345 = vmatprep.mubr.msk.bf16.mxu1 %vm88_vm1, %v363_v12  ;;  %v283_v4 = vshrl.u32 %v282_v3, 7  ;;  %s299_s14 = sshll.u32 %s390_s13, 4  ;;  %s300_s14 = int_to_ptr.vmem [resolvable:$true] %s299_s14 }
   0xb   :  { %s365_s16 = scalar_lea.vmem %s300_s14, 128  ;;  %p370_p1 = scmp.lt.s32.totalorder %s300_s14, %s300_s14 }
   0xc   :  { %165 = vperm.xlu0 %357, %v156_v10   ;;  %170 = vperm.xlu1 %358, %v157_v11   ;;  %vm286_vm4 = vcmp.eq.s32.totalorder %v283_v4, 1  ;;  %vm284_vm5 = vcmp.eq.s32.totalorder %v283_v4, 0  ;;  %p366_p0 = scmp.ne.s32.totalorder %s300_s14, %s365_s16  ;;  %p371_p2 = scmp.lt.s32.totalorder %s365_s16, %s365_s16 }
   0xe   :  { %p372_p3 = por %p371_p2, %p370_p1 }
  0x10   :  { %p373_p4 = pnand %p372_p3, %p366_p0 }
  0x81   :  { %v69_v14 = vpop.permute.xlu1 %68 }
  0x83   :  { %v59_v13 = vpop.permute.xlu0 %58 }
  0x87   :  { %v64_v20 = vpop.permute.xlu0 %63  ;;  %v161_v30 = vpop.permute.xlu1 %160 }
  0x8b   :  { %v171_v32 = vpop.permute.xlu1 %170  ;;  %v166_v37 = vpop.permute.xlu0 %165 }
  0xdd   :  { %v339_v15 = vpop.f32.mrb[0].mxu0 }
  0xde   :  { %v133_v16 = vpop.f32.mrb[1].mxu0  ;;  %v142_v17 = vadd.f32 %v339_v15, %v69_v14 }
  0xdf   :  { %v134_v18 = vadd.f32 %v133_v16, %v59_v13  ;;  %v340_v19 = vpop.f32.mrb[2].mxu0 }
  0xe0   :  { %v136_v21 = vpop.f32.mrb[3].mxu0  ;;  %v149_v23 = vmax.f32 %v142_v17, 0.0 }
  0xe1   :  { %v137_v22 = vadd.f32 %v136_v21, %v64_v20  ;;  %v147_v24 = vmax.f32 %v134_v18, 0.0 }
  0xe2   :  { %v154_v27 = vpack.c.bf16 %v149_v23, %v149_v23 }
  0xe3   :  { %v148_v25 = vmax.f32 %v137_v22, 0.0 }
  0xe4   :  { %v188_v28 = vsel %vm95_vm0, %v154_v27, 0 }
  0xe5   :  { %v153_v26 = vpack.c.bf16 %v148_v25, %v147_v24 }
  0xe7   :  { %341 = vmatprep.subr.bf16.mxu1 %v153_v26 }
  0xe8   :  { %342 = vmatpush3.bf16.msra.mxu1 %v153_v26 }
  0xe9   :  { %350 = vmatprep.subr.msk.bf16.mxu1 %vm95_vm0, %v154_v27 }
  0xec   :  { %344 = vmatpush3.bf16.msra.mxu1 %v188_v28 }
  0xef   :  { %346 = vmatmul.mubr.msk.bf16.vlgmr.msra.gmra.mrb[0].mxu1 %vm88_vm1, %v364_v29 }
 0x1c2   :  { %v347_v31 = vpop.f32.mrb[0].mxu1 }
 0x1c3   :  { %v224_v33 = vpop.f32.mrb[1].mxu1  ;;  %v233_v34 = vadd.f32 %v347_v31, %v171_v32 }
 0x1c4   :  { %v225_v35 = vadd.f32 %v224_v33, %v161_v30  ;;  %v348_v36 = vpop.f32.mrb[2].mxu1 }
 0x1c5   :  { %v227_v38 = vpop.f32.mrb[3].mxu1  ;;  %v241_v41 = vand.u32 2147483647, %v233_v34  ;;  %v265_v46 = vsel %vm246_vm3, %v233_v34, 0.0 }
 0x1c6   :  { %v239_v39 = vand.u32 2147483647, %v225_v35  ;;  %v228_v40 = vadd.f32 %v227_v38, %v166_v37  ;;  %v262_v42 = vsel %vm242_vm2, %v225_v35, 0.0 }
 0x1c7   :  { %v247_v51 = vsel %vm246_vm3, %v241_v41, 0.0 }
 0x1c8   :  { %v240_v43 = vand.u32 2147483647, %v228_v40  ;;  %v263_v44 = vsel %vm242_vm2, %v228_v40, 0.0  ;;  %v243_v47 = vsel %vm242_vm2, %v239_v39, 0.0 }
 0x1c9   :  { %v264_v45 = vadd.f32 %v263_v44, %v262_v42 }
 0x1ca   :  { %v244_v48 = vsel %vm242_vm2, %v240_v43, 0.0 }
 0x1cb   :  { %v266_v49 = vadd.f32 %v265_v46, %v264_v45  ;;  %v245_v50 = vadd.f32 %v244_v48, %v243_v47 }
 0x1cd   :  { %267 = vadd.xlane.f32.xlu1 %v266_v49  ;;  %v248_v52 = vadd.f32 %v247_v51, %v245_v50 }
 0x1cf   :  { %249 = vadd.xlane.f32.xlu0 %v248_v52 }
 0x25a   :  { %v268_v53 = vpop.xlane.xlu1 %267 }
 0x25b   :  { %v269_v54 = vrot.slane %v268_v53, 4 }
 0x25c   :  { %v250_v55 = vpop.xlane.xlu0 %249 }
 0x25d   :  { %v270_v56 = vadd.f32 %v269_v54, %v268_v53  ;;  %v251_v57 = vrot.slane %v250_v55, 4 }
 0x25f   :  { %v271_v58 = vrot.slane %v270_v56, 2  ;;  %v252_v59 = vadd.f32 %v251_v57, %v250_v55 }
 0x261   :  { %v272_v60 = vadd.f32 %v271_v58, %v270_v56  ;;  %v253_v61 = vrot.slane %v252_v59, 2 }
 0x263   :  { %v254_v62 = vadd.f32 %v253_v61, %v252_v59  ;;  %v273_v63 = vrot.slane %v272_v60, 1 }
 0x265   :  { %v255_v0 = vrot.slane %v254_v62, 1  ;;  %v274_v2 = vadd.f32 %v273_v63, %v272_v60 }
 0x267   :  { %v256_v1 = vadd.f32 %v255_v0, %v254_v62 }
 0x269   :  { %351 = vpush %v256_v1 }
 0x26a   :  { %353 = vpush %v274_v2 }
 0x29a   :  { %s352_s3 = spop %351 }
 0x29b   :  { %v290_v5 = vstv %s352_s3  ;;  %s354_s15 = spop %353 }
 0x29c   :  { %v288_v6 = vstv %s354_s15 }
 0x29d   :  { %v289_v7 = vsel %vm286_vm4, %v288_v6, 0.0 }
 0x29e   :  { %v291_v8 = vsel %vm284_vm5, %v290_v5, %v289_v7 }
 0x29f   :  { %292 = vst [vmem:[#allocation3] sm:$0xff] %v291_v8 }
 0x2a0   :  { %376 = shalt.err (!%p373_p4)
}
 0x2a1   :  { %s377_s19 = scalar_lea.hbm %s482_s5, 128 }
 0x2a2   :  { %p378_p5 = scmp.ne.s32.totalorder %s482_s5, %s377_s19  ;;  %p381_p6 = scmp.lt.u32.totalorder %s377_s19, %s482_s5 }
 0x2a4   :  { %p383_p7 = pnand %p381_p6, %p378_p5 }
 0x2a6   :  { %386 = shalt.err (!%p383_p7)
}
 0x2a7   :  { %302 = dma.vmem_to_hbm [thread:$0]  %s300_s14, 128, %s482_s5, [#allocation4]  }
 0x2a8   :  { %387 = dma.done.wait [#allocation4], 128  }
 0x2a9   :  { %388 = vsyncadd [#allocation4], 4294967168 }
 0x2aa   :  { %306 = vsyncpa [#allocation4], 1 }

</bundles_post_ra>
